<compile_context>
chip_gen: v5e
topology: v5e:2x2
jax: 0.10.0
libtpu: 0.0.40
codegen_flags: <defaults>
</compile_context>

<pallas_src>
import functools

import jax
import jax.numpy as jnp
from jax.experimental import pallas as pl
from jax.experimental.pallas import tpu as pltpu

BN_EPS = 1e-5
LANE = 128


# ----------------------------------------------------------------------------
# Tile-size / VMEM helpers (per-generation)
# ----------------------------------------------------------------------------
def _round_up(x, m):
    return ((x + m - 1) // m) * m


def _vmem_capacity_bytes():
    try:
        info = pltpu.get_tpu_info()
        cap = getattr(info, "vmem_capacity_bytes", None)
        if cap:
            return int(cap)
    except Exception:
        pass
    return 64 * 1024 * 1024  # conservative fallback (v7x per-core VMEM)


def _vmem_limit_bytes():
    # ~72% of physical VMEM: ~46 MiB on v7x (64 MiB/core), ~92 MiB on v5e/v6e
    # (128 MiB).  Leaves headroom for Mosaic internal scratch on v7x.
    return int(min(_vmem_capacity_bytes() * 0.72, 100 * 1024 * 1024))


def _pick_tile_rows(M, K_pad, C_pad, *, in_itemsize, h_itemsize, out_itemsize,
                    res_itemsize=0):
    """Balanced row-tile chooser.

    - budgets pass 1 and pass 2 SEPARATELY (separate pallas_calls, they never
      coexist in VMEM),
    - charges the resident weight block (conservatively x2 buffers) to pass 1
      so large-channel layers do not blow v7x's 64 MiB VMEM,
    - guarantees >= 2 tiles whenever M allows so the "parallel" grid axis can
      span both v7x TensorCores,
    - balances tiles (n_tiles = cdiv(M, tm_max); tm = cdiv(M, n_tiles)) so
      M_pad - M padding stays minimal.
    Returns (tm, n_tiles, M_pad)."""
    budget = (_vmem_limit_bytes() * 3) // 4
    p1_fixed = 2 * K_pad * C_pad * in_itemsize            # weight block
    p1_per_row = 2 * (K_pad * in_itemsize + C_pad * h_itemsize)
    p2_per_row = 2 * C_pad * (h_itemsize + out_itemsize + res_itemsize)
    tm1 = (budget - p1_fixed) // max(p1_per_row, 1)
    tm2 = budget // max(p2_per_row, 1)
    tm_max = int(max(16, min(tm1, tm2, 4096)))
    tm_max = (tm_max // 16) * 16
    n_tiles = max(2, pl.cdiv(M, tm_max))                  # use both v7x cores
    n_tiles = min(n_tiles, max(1, pl.cdiv(M, 16)))        # keep tm >= 16
    tm_raw = pl.cdiv(M, n_tiles)
    # v6e/v7x MXUs are 256 wide: prefer 256-granular row tiles only when the
    # stage is compute-heavy (large K) and the tile is big enough to matter.
    gran = 256 if (K_pad >= 512 and tm_raw >= 256) else 16
    tm = _round_up(tm_raw, gran)
    return tm, n_tiles, tm * n_tiles


# ----------------------------------------------------------------------------
# Pallas kernels
# ----------------------------------------------------------------------------
def _matmul_stats_kernel(p_ref, w_ref, h_ref, stats_ref):
    """One M-row tile: MXU matmul (f32 accumulate) + per-tile BN partials.

    Stats (sum / sumsq) are taken from the f32 accumulator BEFORE the possibly
    narrow store of h."""
    h = jnp.dot(p_ref[...], w_ref[...], preferred_element_type=jnp.float32)
    s = jnp.sum(h, axis=0, keepdims=True)           # (1, C_pad)
    ss = jnp.sum(h * h, axis=0, keepdims=True)      # (1, C_pad)
    stats_ref[0] = jnp.concatenate([s, ss], axis=0)  # (2, C_pad)
    h_ref[...] = h.astype(h_ref.dtype)


def _scale_shift_act_kernel(apply_relu, add_residual, *refs):
    """Fused y = h*scale + shift -> [ReLU] -> [+residual, ReLU] (math in f32)."""
    if add_residual:
        h_ref, scale_ref, shift_ref, res_ref, o_ref = refs
    else:
        h_ref, scale_ref, shift_ref, o_ref = refs
    y = h_ref[...].astype(jnp.float32) * scale_ref[...] + shift_ref[...]
    if apply_relu:
        y = jnp.maximum(y, 0.0)
    if add_residual:
        y = jnp.maximum(y + res_ref[...].astype(jnp.float32), 0.0)
    o_ref[...] = y.astype(o_ref.dtype)


# ----------------------------------------------------------------------------
# Fused conv-as-matmul + BatchNorm(+ReLU)(+residual,ReLU) wrapper
# ----------------------------------------------------------------------------
def _conv_bn_act(patches, w_mat, gamma, beta, *, residual=None, relu=True,
                 eps=BN_EPS, mxu_dtype=jnp.bfloat16, out_dtype=jnp.float32,
                 tile_rows=None):
    """patches: (M, Kp) already in the MXU compute dtype (Kp may already be
    lane-padded); w_mat: (K, C) f32 with K <= Kp; gamma/beta: (C,) or (1, C);
    residual: optional (M, C).  Returns (M, C) in out_dtype."""
    M, Kp = patches.shape
    K, C = w_mat.shape
    assert K <= Kp
    K_pad = _round_up(Kp, LANE)
    C_pad = _round_up(C, LANE)
    h_dtype = mxu_dtype                       # narrow pre-BN intermediate
    in_itemsize = jnp.dtype(mxu_dtype).itemsize
    h_itemsize = jnp.dtype(h_dtype).itemsize
    out_itemsize = jnp.dtype(out_dtype).itemsize
    res_itemsize = (jnp.dtype(residual.dtype).itemsize
                    if residual is not None else 0)

    if tile_rows is None:
        tm, n_tiles, M_pad = _pick_tile_rows(
            M, K_pad, C_pad, in_itemsize=in_itemsize, h_itemsize=h_itemsize,
            out_itemsize=out_itemsize, res_itemsize=res_itemsize)
    else:
        tm = max(16, (int(tile_rows) // 16) * 16)
        tm = min(tm, _round_up(M, 16))
        n_tiles = pl.cdiv(M, tm)
        M_pad = n_tiles * tm
    vmem_limit = _vmem_limit_bytes()

    # Zero-pad only when needed (the im2col builder already emits a
    # lane-padded K axis and the balanced tiler usually gives M_pad == M).
    # Padded rows are zero -> contribute 0 to the BN sums; we divide by the
    # true M below.
    p = patches
    if M_pad != M or K_pad != Kp:
        p = jnp.pad(p, ((0, M_pad - M), (0, K_pad - Kp)))
    w = jnp.pad(w_mat.astype(mxu_dtype), ((0, K_pad - K), (0, C_pad - C)))

    # ---- pass 1: matmul + per-tile BN partials --------------------------------
    # TODO(synk): form the 3x3 patches in-kernel from a haloed NHWC slab so the
    # im2col array never hits HBM.
    h, stats = pl.pallas_call(
        _matmul_stats_kernel,
        grid=(n_tiles,),
        in_specs=[
            pl.BlockSpec((tm, K_pad), lambda i: (i, 0)),
            # Constant block index -> fetched once across the grid.
            # TODO(synk): pipeline_mode=pl.Buffered(1) to drop the second
            # weight buffer once confirmed supported on this jax version.
            pl.BlockSpec((K_pad, C_pad), lambda i: (0, 0)),
        ],
        out_specs=(
            pl.BlockSpec((tm, C_pad), lambda i: (i, 0)),
            pl.BlockSpec((1, 2, C_pad), lambda i: (i, 0, 0)),
        ),
        out_shape=(
            jax.ShapeDtypeStruct((M_pad, C_pad), h_dtype),
            jax.ShapeDtypeStruct((n_tiles, 2, C_pad), jnp.float32),
        ),
        compiler_params=pltpu.CompilerParams(
            dimension_semantics=("parallel",),
            vmem_limit_bytes=vmem_limit),
        cost_estimate=pl.CostEstimate(
            flops=2 * M_pad * K_pad * C_pad,
            transcendentals=0,
            bytes_accessed=int(M_pad * K_pad * in_itemsize
                               + K_pad * C_pad * in_itemsize
                               + M_pad * C_pad * h_itemsize
                               + n_tiles * 2 * C_pad * 4)),
    )(p, w)

    # ---- tiny cross-tile reduction + BN coefficient folding (plain JAX) -------
    sum_c = jnp.sum(stats[:, 0, :C], axis=0)
    sumsq_c = jnp.sum(stats[:, 1, :C], axis=0)
    mean = sum_c / M
    var = jnp.maximum(sumsq_c / M - mean * mean, 0.0)   # biased training-mode
    g = gamma.reshape(-1).astype(jnp.float32)
    b = beta.reshape(-1).astype(jnp.float32)
    scale = g * jax.lax.rsqrt(var + eps)
    shift = b - mean * scale
    scale_p = jnp.pad(scale, (0, C_pad - C)).reshape(1, C_pad)
    shift_p = jnp.pad(shift, (0, C_pad - C)).reshape(1, C_pad)

    # ---- pass 2: tiled normalize + activation (+ residual) --------------------
    args = [h, scale_p, shift_p]
    in_specs = [
        pl.BlockSpec((tm, C_pad), lambda i: (i, 0)),
        pl.BlockSpec((1, C_pad), lambda i: (0, 0)),
        pl.BlockSpec((1, C_pad), lambda i: (0, 0)),
    ]
    if residual is not None:
        res = residual
        if res.shape != (M_pad, C_pad):
            res = jnp.pad(res, ((0, M_pad - M), (0, C_pad - C)))
        args.append(res)
        in_specs.append(pl.BlockSpec((tm, C_pad), lambda i: (i, 0)))

    out = pl.pallas_call(
        functools.partial(_scale_shift_act_kernel, relu, residual is not None),
        grid=(n_tiles,),
        in_specs=in_specs,
        out_specs=pl.BlockSpec((tm, C_pad), lambda i: (i, 0)),
        out_shape=jax.ShapeDtypeStruct((M_pad, C_pad), out_dtype),
        compiler_params=pltpu.CompilerParams(
            dimension_semantics=("parallel",),
            vmem_limit_bytes=vmem_limit),
        cost_estimate=pl.CostEstimate(
            flops=4 * M_pad * C_pad,
            transcendentals=0,
            bytes_accessed=int(M_pad * C_pad * (h_itemsize + out_itemsize
                                                + res_itemsize)
                               + 2 * C_pad * 4)),
    )(*args)

    # Padded rows/channels carry shift/ReLU garbage; slice them off here.
    return out[:M, :C]


# ----------------------------------------------------------------------------
# Plain-JAX glue: im2col patch extraction / weight reshape (layout only)
# ----------------------------------------------------------------------------
def _im2col(x_nhwc, ksize, stride, pad, k_pad=None):
    """im2col emitted directly in x's dtype with the K axis zero-padded to
    `k_pad` at build time: one materialization, no separate astype/pad copy."""
    xp = jnp.pad(x_nhwc, ((0, 0), (pad, pad), (pad, pad), (0, 0)))
    N, Hp, Wp, C = xp.shape
    Ho = (Hp - ksize) // stride + 1
    Wo = (Wp - ksize) // stride + 1
    cols = []
    for kh in range(ksize):
        for kw in range(ksize):
            cols.append(xp[:, kh:kh + stride * (Ho - 1) + 1:stride,
                              kw:kw + stride * (Wo - 1) + 1:stride, :])
    K = ksize * ksize * C
    k_pad = K if k_pad is None else k_pad
    if k_pad > K:
        cols.append(jnp.zeros((N, Ho, Wo, k_pad - K), x_nhwc.dtype))
    patches = jnp.concatenate(cols, axis=-1)        # (N, Ho, Wo, k_pad)
    return patches.reshape(N * Ho * Wo, k_pad), Ho, Wo


def _w_to_mat(w_oihw):
    # (Cout, Cin, KH, KW) -> (KH*KW*Cin, Cout), matching im2col column order.
    Cout, Cin, KH, KW = w_oihw.shape
    return jnp.transpose(w_oihw, (2, 3, 1, 0)).reshape(KH * KW * Cin, Cout)


# ----------------------------------------------------------------------------
# ResBlock forward (Pallas)
# ----------------------------------------------------------------------------
def res_block_forward(x_nchw, params, *, mxu_dtype=jnp.bfloat16, tile_rows=None):
    downsample = params["downsample"]
    stride = 2 if downsample else 1

    x = jnp.transpose(x_nchw, (0, 2, 3, 1)).astype(jnp.float32)   # NHWC, f32
    N, H, W, Cin = x.shape
    Cout = params["w1"].shape[0]
    # One narrow copy of the activation; all conv patches are built from it
    # directly in the MXU dtype.
    x_lo = x.astype(mxu_dtype)

    # conv1 (3x3, stride s, pad 1) -> bn1 -> relu.  h1 is emitted in the MXU
    # dtype since it immediately feeds conv2's patches.
    w1 = _w_to_mat(params["w1"])
    p1, Ho, Wo = _im2col(x_lo, 3, stride, 1, k_pad=_round_up(w1.shape[0], LANE))
    h1 = _conv_bn_act(p1, w1, params["g1"], params["b1"], relu=True,
                      mxu_dtype=mxu_dtype, out_dtype=mxu_dtype,
                      tile_rows=tile_rows)

    # shortcut
    if downsample:
        # 1x1 conv, stride 2, no pad -> spatial subsample, then matmul + BN.
        ws = _w_to_mat(params["ws"])
        xs = x_lo[:, ::2, ::2, :].reshape(N * Ho * Wo, Cin)
        sc = _conv_bn_act(xs, ws, params["gs"], params["bs"], relu=False,
                          mxu_dtype=mxu_dtype, out_dtype=jnp.float32,
                          tile_rows=tile_rows)
    else:
        assert Cin == Cout, "identity shortcut requires in_channels == out_channels"
        sc = x.reshape(N * Ho * Wo, Cin)            # keep the skip path in f32

    # conv2 (3x3, stride 1, pad 1) -> bn2 -> relu, then + shortcut, then relu
    w2 = _w_to_mat(params["w2"])
    p2, _, _ = _im2col(h1.reshape(N, Ho, Wo, Cout), 3, 1, 1,
                       k_pad=_round_up(w2.shape[0], LANE))
    y = _conv_bn_act(p2, w2, params["g2"], params["b2"], residual=sc, relu=True,
                     mxu_dtype=mxu_dtype, out_dtype=jnp.float32,
                     tile_rows=tile_rows)

    return jnp.transpose(y.reshape(N, Ho, Wo, Cout), (0, 3, 1, 2))  # NCHW


# ----------------------------------------------------------------------------
# Pure-JAX reference (conv_dtype: conv operand precision; h_store_dtype
# optionally mirrors the kernel's narrow storage of the pre-BN activations —
# BN statistics are always taken from the f32 accumulator).
# ----------------------------------------------------------------------------
def _ref_bn(x, g, b, eps=BN_EPS, store_dtype=None):
    mean = jnp.mean(x, axis=(0, 1, 2), keepdims=True)
    var = jnp.mean(jnp.square(x - mean), axis=(0, 1, 2), keepdims=True)
    if store_dtype is not None:
        x = x.astype(store_dtype).astype(jnp.float32)
    return (x - mean) * jax.lax.rsqrt(var + eps) * g.reshape(1, 1, 1, -1) \
        + b.reshape(1, 1, 1, -1)


def _ref_conv(x_nhwc, w_oihw, stride, pad, conv_dtype):
    w_hwio = jnp.transpose(w_oihw, (2, 3, 1, 0)).astype(conv_dtype)
    return jax.lax.conv_general_dilated(
        x_nhwc.astype(conv_dtype), w_hwio, (stride, stride),
        [(pad, pad), (pad, pad)],
        dimension_numbers=("NHWC", "HWIO", "NHWC"),
        preferred_element_type=jnp.float32)


def res_block_reference(x_nchw, params, conv_dtype=jnp.float32,
                        h_store_dtype=None):
    downsample = params["downsample"]
    stride = 2 if downsample else 1
    x = jnp.transpose(x_nchw, (0, 2, 3, 1)).astype(jnp.float32)

    h = jax.nn.relu(_ref_bn(_ref_conv(x, params["w1"], stride, 1, conv_dtype),
                            params["g1"], params["b1"],
                            store_dtype=h_store_dtype))
    h = jax.nn.relu(_ref_bn(_ref_conv(h, params["w2"], 1, 1, conv_dtype),
                            params["g2"], params["b2"],
                            store_dtype=h_store_dtype))
    if downsample:
        sc = _ref_bn(_ref_conv(x, params["ws"], 2, 0, conv_dtype),
                     params["gs"], params["bs"], store_dtype=h_store_dtype)
    else:
        sc = x
    return jnp.transpose(jax.nn.relu(h + sc), (0, 3, 1, 2))


# ----------------------------------------------------------------------------
# Deterministic parameter construction (per nn.Module __init__ shapes)
# ----------------------------------------------------------------------------
def make_params(key, in_channels, out_channels, downsample):
    ks = jax.random.split(key, 10)
    p = {
        "downsample": downsample,
        "w1": 0.1 * jax.random.normal(ks[0], (out_channels, in_channels, 3, 3),
                                      jnp.float32),
        "w2": 0.1 * jax.random.normal(ks[1], (out_channels, out_channels, 3, 3),
                                      jnp.float32),
        "g1": 1.0 + 0.1 * jax.random.normal(ks[2], (1, out_channels), jnp.float32),
        "b1": 0.1 * jax.random.normal(ks[3], (1, out_channels), jnp.float32),
        "g2": 1.0 + 0.1 * jax.random.normal(ks[4], (1, out_channels), jnp.float32),
        "b2": 0.1 * jax.random.normal(ks[5], (1, out_channels), jnp.float32),
    }
    if downsample:
        p["ws"] = 0.1 * jax.random.normal(
            ks[6], (out_channels, in_channels, 1, 1), jnp.float32)
        p["gs"] = 1.0 + 0.1 * jax.random.normal(ks[7], (1, out_channels),
                                                jnp.float32)
        p["bs"] = 0.1 * jax.random.normal(ks[8], (1, out_channels), jnp.float32)
    return p


# ----------------------------------------------------------------------------
if __name__ == "__main__":
    key = jax.random.PRNGKey(0)
    k_x1, k_p1, k_x2, k_p2 = jax.random.split(key, 4)

    # Case 1: downsample=True (conv1 stride 2 + 1x1-conv/BN shortcut), f32 MXU
    # operands end-to-end -> tight check of the whole tiled two-pass pipeline.
    # tile_rows=64 exercises the explicit-override path (M=128 -> 2 tiles).
    x1 = jax.random.normal(k_x1, (2, 4, 16, 16), jnp.float32)   # NCHW
    params1 = make_params(k_p1, in_channels=4, out_channels=8, downsample=True)
    out1 = jax.block_until_ready(
        res_block_forward(x1, params1, mxu_dtype=jnp.float32, tile_rows=64))
    ref1 = res_block_reference(x1, params1, conv_dtype=jnp.float32)
    assert out1.shape == (2, 8, 8, 8)
    assert jnp.allclose(out1, ref1, atol=2e-4, rtol=2e-4)

    # Case 2: downsample=False (identity shortcut), default bf16 MXU operands,
    # bf16 pre-BN intermediates and bf16 h1 (f32 accumulation, f32 BN stats).
    # Automatic tile chooser (guarantees >= 2 balanced tiles).
    x2 = jax.random.normal(k_x2, (2, 8, 16, 16), jnp.float32)   # NCHW
    params2 = make_params(k_p2, in_channels=8, out_channels=8, downsample=False)
    out2 = jax.block_until_ready(res_block_forward(x2, params2))
    ref2_m = res_block_reference(x2, params2, conv_dtype=jnp.bfloat16,
                                 h_store_dtype=jnp.bfloat16)   # matched ref
    ref2_f32 = res_block_reference(x2, params2, conv_dtype=jnp.float32)
    assert out2.shape == (2, 8, 16, 16)
    assert jnp.allclose(out2, ref2_m, atol=2e-2, rtol=2e-2)
    assert jnp.allclose(out2, ref2_f32, atol=1e-1, rtol=1e-1)  # loose: bf16 path

    print("KERNEL_OK")
</pallas_src>

<mosaic_0001>
module attributes {stable_mosaic.version = 11 : i64} {
  func.func @_matmul_stats_kernel(%arg0: i32, %arg1: memref<64x128xf32, #tpu.memory_space<vmem>>, %arg2: memref<128x128xf32, #tpu.memory_space<vmem>>, %arg3: memref<64x128xf32, #tpu.memory_space<vmem>>, %arg4: memref<1x2x128xf32, #tpu.memory_space<vmem>>) attributes {dimension_semantics = [#tpu.dimension_semantics<parallel>], iteration_bounds = array<i64: 2>, scalar_prefetch = 0 : i64, scratch_operands = 0 : i64, tpu.core_type = #tpu.core_type<tc>, window_params = [{transform_indices = @transform_0, window_bounds = array<i64: 64, 128>}, {pipeline_mode = #tpu.pipeline_mode<synchronous>, transform_indices = @transform_1, window_bounds = array<i64: 128, 128>}, {transform_indices = @transform_2, window_bounds = array<i64: 64, 128>}, {transform_indices = @transform_3, window_bounds = array<i64: 1, 2, 128>}]} {
    %c0 = arith.constant 0 : index
    %c0_0 = arith.constant 0 : index
    %0 = vector.load %arg1[%c0, %c0_0] : memref<64x128xf32, #tpu.memory_space<vmem>>, vector<64x128xf32>
    %c0_1 = arith.constant 0 : index
    %c0_2 = arith.constant 0 : index
    %1 = vector.load %arg2[%c0_1, %c0_2] : memref<128x128xf32, #tpu.memory_space<vmem>>, vector<128x128xf32>
    %cst = arith.constant dense<0.000000e+00> : vector<64x128xf32>
    %2 = tpu.matmul %0, %1, %cst {dimension_numbers = #tpu.dot_dimension_numbers<[1], [0], [0], [1], [0, 0, 1, 1], [], []>} : vector<64x128xf32>, vector<128x128xf32>, vector<64x128xf32> -> vector<64x128xf32>
    %cst_3 = arith.constant dense<0.000000e+00> : vector<128xf32>
    %3 = vector.multi_reduction <add>, %2, %cst_3 [0] : vector<64x128xf32> to vector<128xf32>
    %4 = vector.shape_cast %3 : vector<128xf32> to vector<1x128xf32>
    %5 = arith.mulf %2, %2 : vector<64x128xf32>
    %cst_4 = arith.constant dense<0.000000e+00> : vector<128xf32>
    %6 = vector.multi_reduction <add>, %5, %cst_4 [0] : vector<64x128xf32> to vector<128xf32>
    %7 = vector.shape_cast %6 : vector<128xf32> to vector<1x128xf32>
    %8 = tpu.concatenate %4, %7 in 0 : vector<1x128xf32>, vector<1x128xf32> -> vector<2x128xf32>
    %c0_5 = arith.constant 0 : index
    %c0_6 = arith.constant 0 : index
    %c0_7 = arith.constant 0 : index
    %9 = vector.load %arg4[%c0_5, %c0_6, %c0_7] : memref<1x2x128xf32, #tpu.memory_space<vmem>>, vector<1x2x128xf32>
    %10 = vector.shape_cast %9 : vector<1x2x128xf32> to vector<2x128xf32>
    %11 = vector.shape_cast %8 : vector<2x128xf32> to vector<1x2x128xf32>
    tpu.vector_store %arg4[%c0_5, %c0_6, %c0_7], %11 {strides = array<i32>} : memref<1x2x128xf32, #tpu.memory_space<vmem>>, vector<1x2x128xf32>,
    %c0_8 = arith.constant 0 : index
    %c0_9 = arith.constant 0 : index
    %12 = vector.load %arg3[%c0_8, %c0_9] : memref<64x128xf32, #tpu.memory_space<vmem>>, vector<64x128xf32>
    tpu.vector_store %arg3[%c0_8, %c0_9], %2 {strides = array<i32>} : memref<64x128xf32, #tpu.memory_space<vmem>>, vector<64x128xf32>,
    return
  }
  func.func @transform_0(%arg0: i32) -> (i32, i32) {
    %c0_i32 = arith.constant 0 : i32
    %c0_i32_0 = arith.constant 0 : i32
    return %arg0, %c0_i32 : i32, i32
  }
  func.func @transform_1(%arg0: i32) -> (i32, i32) {
    %c0_i32 = arith.constant 0 : i32
    %c0_i32_0 = arith.constant 0 : i32
    %c0_i32_1 = arith.constant 0 : i32
    return %c0_i32, %c0_i32_0 : i32, i32
  }
  func.func @transform_2(%arg0: i32) -> (i32, i32) {
    %c0_i32 = arith.constant 0 : i32
    %c0_i32_0 = arith.constant 0 : i32
    return %arg0, %c0_i32 : i32, i32
  }
  func.func @transform_3(%arg0: i32) -> (i32, i32, i32) {
    %c0_i32 = arith.constant 0 : i32
    %c0_i32_0 = arith.constant 0 : i32
    %c0_i32_1 = arith.constant 0 : i32
    return %arg0, %c0_i32, %c0_i32_0 : i32, i32, i32
  }
}

</mosaic_0001>

<bundles_post_ra>
// kernel: tpu_custom_call.1
= control target key start
LH: loop header
LB: loop body
LE: loop exit
PB: predicated region body
PF: predicated region fallthrough
CT: control target
= control target key end

     0   :  { %9 = vsyncpa [#allocation3], 0  ;;  %s994_s0 = inlined_call_operand.hbm [shape: f32[128,128], index: 0, kind: input, shape index: {}]   ;;  %s995_s1 = inlined_call_operand.hbm [shape: f32[128,128], index: 1, kind: input, shape index: {}]   ;;  %s996_s2 = inlined_call_operand.hbm [shape: f32[128,128], index: 2, kind: output, shape index: {0}]   ;;  %s997_s3 = inlined_call_operand.hbm [shape: f32[2,2,128], index: 3, kind: output, shape index: {1}]  }
   0x1   :  { %11 = vsyncpa [#allocation3 + $0x1], 0 }
   0x2   :  { %12 = vsyncpa [#allocation6], 0 }
   0x3   :  { %13 = vsyncpa [#allocation4], 0 }
   0x4   :  { %15 = vsyncpa [#allocation4 + $0x1], 0 }
   0x5   :  { %16 = vsyncpa [#allocation9], 0 }
   0x6   :  { %18 = vsyncpa [#allocation9 + $0x1], 0  ;;  %s806_s12 = smov 0   ;;  %s808_s13 = smov 0  }
   0x7   :  { %s810_s14 = smov 0   ;;  %s812_s15 = smov 0  }
   0x8 LB: > { %s827_s16 = sadd.s32 4294967295, %s779_s15   ;;  %s482_s17 = sadd.s32 4294967294, %s779_s15   ;;  %s779_s15 = sphi %s812_s15, %s1007_s15   ;;  %s775_s14 = sphi %s810_s14, %s1006_s14   ;;  %s771_s13 = sphi %s808_s13, %s1005_s13   ;;  %s767_s12 = sphi %s806_s12, %s1004_s12  }
   0x9   : > { %p44_p0 = scmp.ne.s32.totalorder %s771_s13, %s767_s12  ;;  %p45_p1 = scmp.eq.s32.totalorder %s827_s16, 0 }
   0xa   : > { %p89_p2 = scmp.eq.s32.totalorder %s827_s16, 1  ;;  %p95_p3 = scmp.eq.s32.totalorder %s482_s17, 1 }
   0xb   : > { %p836_p4 = por %p45_p1, %p44_p0  ;;  %p483_p5 = scmp.ge.s32.totalorder %s779_s15, 1 }
   0xc   : > { %p841_p6 = por %p95_p3, %p44_p0  ;;  %p128_p7 = scmp.lt.s32.totalorder %s779_s15, 3 }
   0xd   : > { %s139_s22 = sshll.u32 %s995_s1, 4  ;;  %s781_s24 = smov [#allocation5]   ;;  %s140_s22 = int_to_ptr.hbm [resolvable:$true] %s139_s22 }
   0xe   : > { %p849_p8 = pnand %p483_p5, %p128_p7  ;;  %s141_s25 = sshll.u32 %s781_s24, 4  ;;  %s142_s25 = int_to_ptr.vmem [resolvable:$true] %s141_s25 }
   0xf   : > { %s859_s26 = sadd.s32 1, %s779_s15   ;;  %s782_s27 = smov 128  }
  0x10   : > { %p561_p9 = pneg %p849_p8  ;;  %s783_s28 = smov 8  }
  0x11   : > { %s28_s29 = ssub.s32 %s779_s15, %s859_s26  ;;  %s31_s30 = sadd.s32 1, %s775_s14 }
  0x12   : > { %p562_p10 = pnand %p561_p9, %p45_p1  ;;  %p29_p12 = scmp.eq.s32.totalorder %s28_s29, 0 }
  0x13   : > { %p38_p13 = scmp.ne.s32.totalorder %s775_s14, %s771_s13  ;;  %p39_p0 = scmp.eq.s32.totalorder %s779_s15, 0 }
  0x14   : > { %564 = dma.hbm_to_vmem [thread:$0]  (!%p562_p10), %s140_s22, 2048, %s142_s25, [#allocation6], %s782_s27, %s782_s27, %s783_s28  }
  0x15   : > { %s871_s4 = scalar_select %p29_p12, %s775_s14, %s31_s30  }
  0x16   : > { %p875_p3 = por %p89_p2, %p38_p13  ;;  %p577_p5 = scmp.lt.s32.totalorder %s779_s15, 2 }
  0x17   : > { %s155_s6 = sand.u32 1, %s775_s14   ;;  %s501_s7 = sshll.u32 %s779_s15, 6 }
  0x18   : > { %p40_p7 = por %p39_p0, %p38_p13  ;;  %s486_s8 = sshll.u32 %s155_s6, 6 }
  0x19   : > { %s164_s11 = scalar_lea.hbm %s994_s0, %s501_s7  ;;  %s159_s20 = scalar_lea.vmem [#allocation2], %s486_s8 }
  0x1a   : > { %s165_s17 = sshll.u32 %s164_s11, 4  ;;  %s167_s21 = sshll.u32 %s159_s20, 4  ;;  %s166_s17 = int_to_ptr.hbm [resolvable:$true] %s165_s17  ;;  %s168_s21 = int_to_ptr.vmem [resolvable:$true] %s167_s21 }
  0x1b   : > { %p885_p9 = pnand %p577_p5, %p40_p7  ;;  %s156_s24 = scalar_lea.sflag [#allocation3], %s155_s6 }
  0x1c   : > { %s647_s25 = sshra.s32 %s166_s17, 4  ;;  %s654_s8 = scalar_lea.hbm %s994_s0, 128  ;;  %s648_s25 = int_to_ptr.hbm [resolvable:$true] %s647_s25 }
  0x1d   : > { %s649_s29 = scalar_lea.hbm %s648_s25, 64  ;;  %p651_p10 = pneg %p885_p9 }
  0x1e   : > { %p650_p2 = scmp.ne.s32.totalorder %s648_s25, %s649_s29  ;;  %p655_p0 = scmp.lt.s32.totalorder %s648_s25, %s994_s0 }
  0x1f   : > { %p656_p5 = scmp.lt.s32.totalorder %s654_s8, %s649_s29 }
  0x20   : > { %p652_p12 = pnand %p651_p10, %p650_p2 }
  0x21   : > { %p657_p7 = por %p656_p5, %p655_p0 }
  0x22   : > { %p653_p13 = pneg %p652_p12 }
  0x24   : > { %p658_p11 = pnand %p657_p7, %p653_p13 }
  0x26   : > { %661 = shalt.err (!%p658_p11)
}
  0x27   : > { %568 = dma.hbm_to_vmem [thread:$0]  (!%p885_p9), %s166_s17, 1024, %s168_s21, %s156_s24, %s782_s27, %s782_s27, %s783_s28  }
  0x28   : > { %179 = sbr.rel (%p849_p8) target bundleno = 246 (0xf6), region = 28  ;;  %s905_s6 = sand.u32 (!%p849_p8), 1, %s771_s13  }
  0x29   : > { %s490_s11 = sshll.u32 (!%p849_p8), %s905_s6, 6  ;;  %s182_s20 = scalar_lea.sflag (!%p849_p8), [#allocation3], %s905_s6 }
  0x2a   : > { %s911_s25 = scalar_lea.vmem (!%p849_p8), [#allocation2], %s490_s11 }
  0x2d   : > { %750 = dma.done.wait (%p836_p4), %s182_s20, 1024  }
  0x2e   : > { %752 = vsyncadd (%p836_p4), %s182_s20, 4294966272 }
  0x2f   : > { %754 = dma.done.wait (%p45_p1), [#allocation6], 2048  }
  0x30   : > { %756 = vsyncadd (%p45_p1), [#allocation6], 4294965248  ;;  %v244_v0 = vld [vmem:[#allocation5 + $0x78] sm:$0xff]  ;;  %v243_v1 = vld [vmem:[#allocation5 + $0x70] sm:$0xff]  ;;  %s931_s18 = scalar_lea.vmem [#allocation7], %s490_s11  ;;  %s502_s23 = sshll.u32 %s827_s16, 6 }
  0x31   : > { %245 = vmatpush.msra.mxu0 %v244_v0  ;;  %504 = vmatpush.msra.mxu2 %v244_v0  ;;  %v242_v2 = vld [vmem:[#allocation5 + $0x68] sm:$0xff]  ;;  %v241_v3 = vld [vmem:[#allocation5 + $0x60] sm:$0xff]  ;;  %v240_v4 = vld [vmem:[#allocation5 + $0x58] sm:$0xff]  ;;  %s348_s17 = scalar_lea.hbm %s996_s2, %s502_s23  ;;  %s349_s21 = sshll.u32 %s931_s18, 4  ;;  %s944_s21 = int_to_ptr.vmem [resolvable:$true] %s349_s21 }
  0x32   : > { %503 = vmatpush.msra.mxu1 %v244_v0  ;;  %505 = vmatpush.msra.mxu3 %v244_v0  ;;  %v239_v5 = vld [vmem:[#allocation5 + $0x50] sm:$0xff]  ;;  %v238_v6 = vld [vmem:[#allocation5 + $0x48] sm:$0xff]  ;;  %v237_v7 = vld [vmem:[#allocation5 + $0x40] sm:$0xff]  ;;  %s351_s22 = sshll.u32 %s348_s17, 4  ;;  %s332_s24 = scalar_lea.sflag [#allocation4], %s905_s6  ;;  %s352_s22 = int_to_ptr.hbm [resolvable:$true] %s351_s22 }
  0x33   : > { %246 = vmatpush.msra.mxu0 %v243_v1  ;;  %507 = vmatpush.msra.mxu2 %v243_v1  ;;  %v236_v8 = vld [vmem:[#allocation5 + $0x38] sm:$0xff]  ;;  %v235_v9 = vld [vmem:[#allocation5 + $0x30] sm:$0xff]  ;;  %v234_v10 = vld [vmem:[#allocation5 + $0x28] sm:$0xff]  ;;  %s691_s29 = sshra.s32 %s352_s22, 4  ;;  %s697_s9 = scalar_lea.hbm %s996_s2, 128  ;;  %s692_s29 = int_to_ptr.hbm [resolvable:$true] %s691_s29 }
  0x34   : > { %506 = vmatpush.msra.mxu1 %v243_v1  ;;  %508 = vmatpush.msra.mxu3 %v243_v1  ;;  %v233_v11 = vld [vmem:[#allocation5 + $0x20] sm:$0xff]  ;;  %v232_v12 = vld [vmem:[#allocation5 + $0x18] sm:$0xff]  ;;  %v231_v13 = vld [vmem:[#allocation5 + $0x10] sm:$0xff]  ;;  %s693_s30 = scalar_lea.hbm %s692_s29, 64  ;;  %p698_p11 = scmp.lt.s32.totalorder %s692_s29, %s996_s2 }
  0x35   : > { %247 = vmatpush.msra.mxu0 %v242_v2  ;;  %510 = vmatpush.msra.mxu2 %v242_v2  ;;  %v230_v14 = vld [vmem:[#allocation5 + $0x8] sm:$0xff]  ;;  %v229_v15 = vld [vmem:[#allocation5] sm:$0xff]  ;;  %v223_v18 = vld [vmem:[%s911_s25 + $0x10] sm:$0xff]  ;;  %p694_p1 = scmp.ne.s32.totalorder %s692_s29, %s693_s30  ;;  %p699_p9 = scmp.lt.s32.totalorder %s697_s9, %s693_s30 }
  0x36   : > { %509 = vmatpush.msra.mxu1 %v242_v2  ;;  %511 = vmatpush.msra.mxu3 %v242_v2  ;;  %v221_v16 = vld [vmem:[%s911_s25] sm:$0xff]  ;;  %v227_v19 = vld [vmem:[%s911_s25 + $0x30] sm:$0xff]  ;;  %v222_v20 = vld [vmem:[%s911_s25 + $0x8] sm:$0xff] }
  0x37   : > { %248 = vmatpush.msra.mxu0 %v241_v3  ;;  %513 = vmatpush.msra.mxu2 %v241_v3  ;;  %v225_v17 = vld [vmem:[%s911_s25 + $0x20] sm:$0xff]  ;;  %v226_v21 = vld [vmem:[%s911_s25 + $0x28] sm:$0xff]  ;;  %v224_v22 = vld [vmem:[%s911_s25 + $0x18] sm:$0xff]  ;;  %p695_p4 = pnand %p694_p1, %p875_p3  ;;  %p700_p2 = por %p699_p9, %p698_p11 }
  0x38   : > { %512 = vmatpush.msra.mxu1 %v241_v3  ;;  %514 = vmatpush.msra.mxu3 %v241_v3  ;;  %v228_v23 = vld [vmem:[%s911_s25 + $0x38] sm:$0xff] }
  0x39   : > { %249 = vmatpush.msra.mxu0 %v240_v4  ;;  %516 = vmatpush.msra.mxu2 %v240_v4  ;;  %p696_p8 = pneg %p695_p4 }
  0x3a   : > { %515 = vmatpush.msra.mxu1 %v240_v4  ;;  %517 = vmatpush.msra.mxu3 %v240_v4 }
  0x3b   : > { %250 = vmatpush.msra.mxu0 %v239_v5  ;;  %519 = vmatpush.msra.mxu2 %v239_v5  ;;  %p701_p10 = pnand %p700_p2, %p696_p8 }
  0x3c   : > { %518 = vmatpush.msra.mxu1 %v239_v5  ;;  %520 = vmatpush.msra.mxu3 %v239_v5 }
  0x3d   : > { %251 = vmatpush.msra.mxu0 %v238_v6  ;;  %522 = vmatpush.msra.mxu2 %v238_v6 }
  0x3e   : > { %521 = vmatpush.msra.mxu1 %v238_v6  ;;  %523 = vmatpush.msra.mxu3 %v238_v6 }
  0x3f   : > { %252 = vmatpush.msra.mxu0 %v237_v7  ;;  %525 = vmatpush.msra.mxu2 %v237_v7 }
  0x40   : > { %524 = vmatpush.msra.mxu1 %v237_v7  ;;  %526 = vmatpush.msra.mxu3 %v237_v7 }
  0x41   : > { %253 = vmatpush.msra.mxu0 %v236_v8  ;;  %528 = vmatpush.msra.mxu2 %v236_v8 }
  0x42   : > { %527 = vmatpush.msra.mxu1 %v236_v8  ;;  %529 = vmatpush.msra.mxu3 %v236_v8 }
  0x43   : > { %254 = vmatpush.msra.mxu0 %v235_v9  ;;  %531 = vmatpush.msra.mxu2 %v235_v9 }
  0x44   : > { %530 = vmatpush.msra.mxu1 %v235_v9  ;;  %532 = vmatpush.msra.mxu3 %v235_v9 }
  0x45   : > { %255 = vmatpush.msra.mxu0 %v234_v10  ;;  %534 = vmatpush.msra.mxu2 %v234_v10 }
  0x46   : > { %533 = vmatpush.msra.mxu1 %v234_v10  ;;  %535 = vmatpush.msra.mxu3 %v234_v10 }
  0x47   : > { %256 = vmatpush.msra.mxu0 %v233_v11  ;;  %537 = vmatpush.msra.mxu2 %v233_v11 }
  0x48   : > { %536 = vmatpush.msra.mxu1 %v233_v11  ;;  %538 = vmatpush.msra.mxu3 %v233_v11 }
  0x49   : > { %257 = vmatpush.msra.mxu0 %v232_v12  ;;  %540 = vmatpush.msra.mxu2 %v232_v12 }
  0x4a   : > { %539 = vmatpush.msra.mxu1 %v232_v12  ;;  %541 = vmatpush.msra.mxu3 %v232_v12 }
  0x4b   : > { %258 = vmatpush.msra.mxu0 %v231_v13  ;;  %543 = vmatpush.msra.mxu2 %v231_v13 }
  0x4c   : > { %542 = vmatpush.msra.mxu1 %v231_v13  ;;  %544 = vmatpush.msra.mxu3 %v231_v13 }
  0x4d   : > { %259 = vmatpush.msra.mxu0 %v230_v14  ;;  %546 = vmatpush.msra.mxu2 %v230_v14 }
  0x4e   : > { %545 = vmatpush.msra.mxu1 %v230_v14  ;;  %547 = vmatpush.msra.mxu3 %v230_v14 }
  0x4f   : > { %260 = vmatpush.msra.mxu0 %v229_v15  ;;  %549 = vmatpush.msra.mxu2 %v229_v15 }
  0x50   : > { %261 = vmatmul.f32.vlgmr.msra.gmra.mxu0 %v221_v16  ;;  %273 = vmatmul.f32.vlgmr.msra.gmra.mxu2 %v225_v17 }
  0x51   : > { %548 = vmatpush.msra.mxu1 %v229_v15  ;;  %550 = vmatpush.msra.mxu3 %v229_v15 }
  0x52   : > { %267 = vmatmul.f32.vlgmr.msra.gmra.mxu1 %v223_v18  ;;  %279 = vmatmul.f32.vlgmr.msra.gmra.mxu3 %v227_v19 }
  0x58   : > { %264 = vmatmul.f32.gmra.mxu0 %v222_v20  ;;  %276 = vmatmul.f32.gmra.mxu2 %v226_v21 }
  0x5a   : > { %270 = vmatmul.f32.gmra.mxu1 %v224_v22  ;;  %282 = vmatmul.f32.gmra.mxu3 %v228_v23 }
  0xcd   : > { %v262_v24 = vpop.f32.mrf.mxu0 }
  0xce   : > { %323 = vst [vmem:[%s931_s18] sm:$0xff] %v262_v24  ;;  %v299_v29 = vmul.f32 %v262_v24, %v262_v24 }
  0xcf   : > { %v268_v25 = vpop.f32.mrf.mxu1 }
  0xd0   : > { %325 = vst [vmem:[%s931_s18 + $0x10] sm:$0xff] %v268_v25  ;;  %v301_v33 = vmul.f32 %v268_v25, %v268_v25 }
  0xd3   : > { %v274_v26 = vpop.f32.mrf.mxu2 }
  0xd4   : > { %327 = vst [vmem:[%s931_s18 + $0x20] sm:$0xff] %v274_v26  ;;  %v303_v40 = vmul.f32 %v274_v26, %v274_v26 }
  0xd5   : > { %v265_v27 = vpop.f32.mrf.mxu0  ;;  %v280_v28 = vpop.f32.mrf.mxu3 }
  0xd6   : > { %v286_v30 = vadd.f32 %v265_v27, %v262_v24  ;;  %v300_v31 = vmul.f32 %v265_v27, %v265_v27  ;;  %324 = vst [vmem:[%s931_s18 + $0x8] sm:$0xff] %v265_v27 }
  0xd7   : > { %v271_v32 = vpop.f32.mrf.mxu1  ;;  %329 = vst [vmem:[%s931_s18 + $0x30] sm:$0xff] %v280_v28 }
  0xd8   : > { %v307_v34 = vadd.f32 %v300_v31, %v299_v29  ;;  %v287_v35 = vadd.f32 %v286_v30, %v268_v25  ;;  %v302_v36 = vmul.f32 %v271_v32, %v271_v32  ;;  %326 = vst [vmem:[%s931_s18 + $0x18] sm:$0xff] %v271_v32 }
  0xda   : > { %v288_v37 = vadd.f32 %v287_v35, %v271_v32  ;;  %v308_v38 = vadd.f32 %v307_v34, %v301_v33 }
  0xdb   : > { %v277_v39 = vpop.f32.mrf.mxu2 }
  0xdc   : > { %v309_v41 = vadd.f32 %v308_v38, %v302_v36  ;;  %v289_v42 = vadd.f32 %v288_v37, %v274_v26  ;;  %v304_v43 = vmul.f32 %v277_v39, %v277_v39  ;;  %328 = vst [vmem:[%s931_s18 + $0x28] sm:$0xff] %v277_v39 }
  0xdd   : > { %v283_v44 = vpop.f32.mrf.mxu3 }
  0xde   : > { %v290_v45 = vadd.f32 %v289_v42, %v277_v39  ;;  %v310_v46 = vadd.f32 %v309_v41, %v303_v40  ;;  %330 = vst [vmem:[%s931_s18 + $0x38] sm:$0xff] %v283_v44 }
  0xdf   : > { %704 = shalt.err (!%p701_p10)
}
  0xe0   : > { %s784_s20 = smov 128   ;;  %s785_s25 = smov 8   ;;  %v305_v47 = vmul.f32 %v280_v28, %v280_v28  ;;  %v311_v48 = vadd.f32 %v310_v46, %v304_v43  ;;  %v291_v49 = vadd.f32 %v290_v45, %v280_v28  ;;  %v306_v50 = vmul.f32 %v283_v44, %v283_v44 }
  0xe1   : > { %557 = dma.vmem_to_hbm [thread:$0]  (%p875_p3), %s944_s21, 1024, %s352_s22, %s332_s24, %s784_s20, %s784_s20, %s785_s25   ;;  %vm320_vm0 = vcmask 1040384  }
  0xe2   : > { %v292_v51 = vadd.f32 %v291_v49, %v283_v44  ;;  %v312_v52 = vadd.f32 %v311_v48, %v305_v47  ;;  %s493_s18 = sshll.u32 %s905_s6, 1  ;;  %s498_s23 = sshll.u32 %s827_s16, 1 }
  0xe3   : > { %s364_s17 = scalar_lea.hbm %s997_s3, %s498_s23  ;;  %s218_s21 = scalar_lea.vmem [#allocation8], %s493_s18 }
  0xe4   : > { %v293_v53 = vrot.slane %v292_v51, 4  ;;  %v313_v54 = vadd.f32 %v312_v52, %v306_v50  ;;  %s366_s22 = sshll.u32 %s218_s21, 4  ;;  %s368_s24 = sshll.u32 %s364_s17, 4  ;;  %s367_s22 = int_to_ptr.vmem [resolvable:$true] %s366_s22  ;;  %s369_s24 = int_to_ptr.hbm [resolvable:$true] %s368_s24 }
  0xe5   : > { %s337_s16 = scalar_lea.sflag [#allocation9], %s905_s6  ;;  %s719_s29 = sshra.s32 %s369_s24, 4  ;;  %s720_s29 = int_to_ptr.hbm [resolvable:$true] %s719_s29 }
  0xe6   : > { %v294_v55 = vadd.f32 %v293_v53, %v292_v51  ;;  %v314_v56 = vrot.slane %v313_v54, 4  ;;  %s721_s30 = scalar_lea.hbm %s720_s29, 2  ;;  %s725_s9 = scalar_lea.hbm %s997_s3, 4 }
  0xe7   : > { %p722_p12 = scmp.ne.s32.totalorder %s720_s29, %s721_s30  ;;  %p726_p5 = scmp.lt.s32.totalorder %s720_s29, %s997_s3 }
  0xe8   : > { %v295_v57 = vrot.slane %v294_v55, 2  ;;  %v315_v58 = vadd.f32 %v314_v56, %v313_v54  ;;  %p727_p7 = scmp.lt.s32.totalorder %s725_s9, %s721_s30 }
  0xe9   : > { %p723_p13 = pnand %p722_p12, %p875_p3 }
  0xea   : > { %v296_v59 = vadd.f32 %v295_v57, %v294_v55  ;;  %v316_v60 = vrot.slane %v315_v58, 2  ;;  %p728_p1 = por %p727_p7, %p726_p5 }
  0xeb   : > { %p724_p0 = pneg %p723_p13 }
  0xec   : > { %v297_v61 = vrot.slane %v296_v59, 1  ;;  %v317_v62 = vadd.f32 %v316_v60, %v315_v58 }
  0xed   : > { %p729_p4 = pnand %p728_p1, %p724_p0 }
  0xee   : > { %v318_v63 = vrot.slane %v317_v62, 1  ;;  %v298_v0 = vadd.f32 %v297_v61, %v296_v59 }
  0xf0   : > { %v319_v1 = vadd.f32 %v318_v63, %v317_v62 }
  0xf2   : > { %v321_v2 = vsel %vm320_vm0, %v298_v0, %v319_v1 }
  0xf3   : > { %322 = vst [vmem:[%s218_s21] sm:$0x3] %v321_v2 }
  0xf4   : > { %732 = shalt.err (!%p729_p4)
}
  0xf5   : > { %558 = dma.vmem_to_hbm [thread:$0]  (%p875_p3), %s367_s22, 32, %s369_s24, %s337_s16  }
  0xf6 PF: > { %s380_s6 = sand.u32 1, %s767_s12   ;;  %p1003_p8 = scmp.ge.s32.totalorder %s779_s15, 2 }
  0xf7   : > { %s381_s20 = scalar_lea.sflag [#allocation4], %s380_s6 }
  0xf8   : > { %p570_p11 = pnand %p1003_p8, %p841_p6 }
  0xfa   : > { %p571_p9 = pneg %p570_p11 }
  0xfc   : > { %758 = dma.done.wait (%p571_p9), %s381_s20, 1024  }
  0xfd   : > { %760 = vsyncadd (%p571_p9), %s381_s20, 4294966272  ;;  %s391_s25 = scalar_lea.sflag [#allocation9], %s380_s6 }
  0xfe   : > { %762 = dma.done.wait (%p571_p9), %s391_s25, 32  }
  0xff   : > { %764 = vsyncadd (%p571_p9), %s391_s25, 4294967264  ;;  %p21_p3 = scmp.ge.s32.totalorder %s859_s26, 4   ;;  %s1004_s12 = smov %s771_s13 }
 0x100   : > { %s1005_s13 = smov %s775_s14  ;;  %s1006_s14 = smov %s871_s4 }
 0x101   : > { %s1007_s15 = smov %s859_s26  ;;  %23 = sbr.rel (!%p21_p3) target bundleno = 8 (0x8), region = 94 }
 0x106   :  { %397 = vsyncpa [#allocation3], 1 }
 0x107   :  { %399 = vsyncpa [#allocation3 + $0x1], 1 }
 0x108   :  { %400 = vsyncpa [#allocation6], 1 }
 0x109   :  { %401 = vsyncpa [#allocation4], 1 }
 0x10a   :  { %403 = vsyncpa [#allocation4 + $0x1], 1 }
 0x10b   :  { %404 = vsyncpa [#allocation9], 1 }
 0x10c   :  { %406 = vsyncpa [#allocation9 + $0x1], 1 }

</bundles_post_ra>
